<compile_context>
chip_gen: v7x
topology: tpu7x:2x2x1
jax: 0.10.0
libtpu: 0.0.40
codegen_flags: <defaults>
</compile_context>

<pallas_src>
import math
import jax
import jax.numpy as jnp
from jax.experimental import pallas as pl
from jax.experimental.pallas import tpu as pltpu


# ----------------------------------------------------------------------------
# Fused kernels
# ----------------------------------------------------------------------------

def _prenet_kernel(x_ref, w1_ref, s1_ref, t1_ref, w2_ref, s2_ref, t2_ref,
                   w3_ref, s3_ref, t3_ref, pw_ref, pb_ref, pos_ref, alpha_ref,
                   o_ref, pad_sc, col_sc):
    """EncoderPrenet fused: 3x (conv1d k=5 same-pad + BN(eval) + ReLU) ->
    projection Linear -> pos_emb * alpha + x.  All intermediates stay in VMEM.

    x_ref: (1,T,E) f32; w*: (5*Cin, Cout) bf16 (im2col-repacked); s*/t*: (1,Cout)
    folded BN; pw: (H,H) bf16; pb: (1,H); pos: (1,T,H); alpha: (1,1) in SMEM;
    o: (1,T,H) bf16.  pad_sc: (T+4, Cmax) f32; col_sc: (T, 5*Cmax) bf16.
    """
    T = o_ref.shape[1]
    K = 5
    P = (K - 1) // 2

    # Zero once: only the 2 pad rows at each end matter; interior rows are
    # fully overwritten by every conv, unused lanes are never read.
    pad_sc[...] = jnp.zeros_like(pad_sc)

    def conv_bn_relu(y, cin, w_ref, scale, shift):
        # y: [T, cin] f32. Build im2col [T, K*cin] in VMEM (5 lane-slab stores)
        # and run ONE matmul with a K-fold larger contraction dim.
        pad_sc[P:P + T, :cin] = y
        for k in range(K):                                  # static unroll
            col_sc[:, k * cin:(k + 1) * cin] = (
                pad_sc[k:k + T, :cin].astype(jnp.bfloat16))
        acc = jnp.dot(col_sc[:, :K * cin], w_ref[...],
                      preferred_element_type=jnp.float32)
        return jnp.maximum(acc * scale + shift, 0.0)        # folded BN + ReLU

    x = x_ref[0].astype(jnp.float32)                        # [T, E]
    E = x.shape[1]
    H = o_ref.shape[2]
    y = conv_bn_relu(x, E, w1_ref, s1_ref[0], t1_ref[0])
    y = conv_bn_relu(y, H, w2_ref, s2_ref[0], t2_ref[0])
    y = conv_bn_relu(y, H, w3_ref, s3_ref[0], t3_ref[0])
    proj = jnp.dot(y.astype(jnp.bfloat16), pw_ref[...],
                   preferred_element_type=jnp.float32) + pb_ref[0]
    out = pos_ref[0].astype(jnp.float32) * alpha_ref[0, 0] + proj
    o_ref[0] = out.astype(o_ref.dtype)


def _layers_kernel(x_ref, wqkv_ref, wfx_ref, wfr_ref, bf_ref, g1_ref, bt1_ref,
                   w1_ref, b1_ref, w2_ref, b2_ref, g2_ref, bt2_ref,
                   o_ref, attn_ref, res_sc):
    """All transformer blocks fused over grid=(B, L).  Per step: multi-head
    self-attention (fused QKV, per-head softmax, eval -> no mask), final
    linear split as x@wf_top + result@wf_bot, residual + LayerNorm, FFN
    (Linear -> ReLU -> Linear), residual + LayerNorm.

    The activation is carried across the L axis in the resident o_ref block
    (same output block index for every l of a given b), so layer-to-layer
    activations never round-trip HBM.

    x_ref: (1,T,H) bf16 (prenet output, read only at l==0);
    weights carry a leading per-layer dim of 1 (streamed by the l grid axis);
    o_ref: (1,T,H) bf16; attn_ref: (heads,1,T,T) bf16 (torch heads-major);
    res_sc: (T,H) f32 scratch for per-head contexts.
    """
    l = pl.program_id(1)

    @pl.when(l == 0)
    def _():                                  # seed the activation carry
        o_ref[...] = x_ref[...]

    x = o_ref[0].astype(jnp.float32)                        # [T, H]
    H = x.shape[1]
    heads = attn_ref.shape[0]
    d = H // heads

    xb = x.astype(jnp.bfloat16)
    qkv = jnp.dot(xb, wqkv_ref[0], preferred_element_type=jnp.float32)  # [T,3H]

    # TODO(synk): pack two heads per 128-lane slab (or use head_dim=128) to fill
    # the 256-wide MXU on v6e/v7x; flash-style KV tiling is not applied because
    # the module returns the full [T,T] attention maps anyway.
    for h in range(heads):                                  # static unroll
        q = qkv[:, h * d:(h + 1) * d]
        k = qkv[:, H + h * d:H + (h + 1) * d]
        v = qkv[:, 2 * H + h * d:2 * H + (h + 1) * d]
        s = jnp.dot(q.astype(jnp.bfloat16), k.astype(jnp.bfloat16).T,
                    preferred_element_type=jnp.float32)     # scale folded in wq
        m = jnp.max(s, axis=-1, keepdims=True)
        e = jnp.exp(s - m)                                  # softmax in f32
        a = e * pl.reciprocal(jnp.sum(e, axis=-1, keepdims=True), approx=True)
        attn_ref[h, 0] = a.astype(attn_ref.dtype)           # bf16 attention map
        # write context straight into its lane slab: no concat, bounded liveness
        res_sc[:, h * d:(h + 1) * d] = jnp.dot(
            a.astype(jnp.bfloat16), v.astype(jnp.bfloat16),
            preferred_element_type=jnp.float32)
    result = res_sc[...]

    out = (jnp.dot(xb, wfx_ref[0], preferred_element_type=jnp.float32)
           + jnp.dot(result.astype(jnp.bfloat16), wfr_ref[0],
                     preferred_element_type=jnp.float32)
           + bf_ref[0, 0] + x)                              # final linear + residual
    mu = jnp.mean(out, axis=-1, keepdims=True)              # LayerNorm 1 (f32)
    var = jnp.mean((out - mu) ** 2, axis=-1, keepdims=True)
    out = (out - mu) * jax.lax.rsqrt(var + 1e-5) * g1_ref[0, 0] + bt1_ref[0, 0]

    # TODO(synk): tile the FFN over the 4H dim (stream w1/w2 blocks into an
    # accumulator) for the v7x 64 MiB VMEM budget at BERT-base scale.
    h1 = jnp.dot(out.astype(jnp.bfloat16), w1_ref[0],
                 preferred_element_type=jnp.float32) + b1_ref[0, 0]
    h1 = jnp.maximum(h1, 0.0)
    h2 = jnp.dot(h1.astype(jnp.bfloat16), w2_ref[0],
                 preferred_element_type=jnp.float32) + b2_ref[0, 0]
    out2 = h2 + out                                         # residual
    mu = jnp.mean(out2, axis=-1, keepdims=True)             # LayerNorm 2 (f32)
    var = jnp.mean((out2 - mu) ** 2, axis=-1, keepdims=True)
    out2 = (out2 - mu) * jax.lax.rsqrt(var + 1e-5) * g2_ref[0, 0] + bt2_ref[0, 0]
    o_ref[0] = out2.astype(o_ref.dtype)


# ----------------------------------------------------------------------------
# Pallas wrappers
# ----------------------------------------------------------------------------

def encoder_prenet(x_emb, pos, p):
    B, T, E = x_emb.shape
    H = p["proj_w"].shape[1]
    Cmax = max(E, H)
    (w1, s1, t1), (w2, s2, t2), (w3, s3, t3) = p["prenet_convs"]
    return pl.pallas_call(
        _prenet_kernel,
        out_shape=jax.ShapeDtypeStruct((B, T, H), jnp.bfloat16),
        grid_spec=pltpu.PrefetchScalarGridSpec(
            num_scalar_prefetch=0, grid=(B,),
            in_specs=[
                pl.BlockSpec((1, T, E), lambda b: (b, 0, 0)),
                pl.BlockSpec(w1.shape, lambda b: (0, 0)),
                pl.BlockSpec(s1.shape, lambda b: (0, 0)),
                pl.BlockSpec(t1.shape, lambda b: (0, 0)),
                pl.BlockSpec(w2.shape, lambda b: (0, 0)),
                pl.BlockSpec(s2.shape, lambda b: (0, 0)),
                pl.BlockSpec(t2.shape, lambda b: (0, 0)),
                pl.BlockSpec(w3.shape, lambda b: (0, 0)),
                pl.BlockSpec(s3.shape, lambda b: (0, 0)),
                pl.BlockSpec(t3.shape, lambda b: (0, 0)),
                pl.BlockSpec((H, H), lambda b: (0, 0)),          # proj_w
                pl.BlockSpec((1, H), lambda b: (0, 0)),          # proj_b
                pl.BlockSpec((1, T, H), lambda b: (b, 0, 0)),    # pos emb
                pl.BlockSpec(memory_space=pltpu.MemorySpace.SMEM),  # alpha scalar
            ],
            out_specs=pl.BlockSpec((1, T, H), lambda b: (b, 0, 0)),
            scratch_shapes=[pltpu.VMEM((T + 4, Cmax), jnp.float32),
                            pltpu.VMEM((T, 5 * Cmax), jnp.bfloat16)],
        ),
        compiler_params=pltpu.CompilerParams(
            dimension_semantics=("parallel",),
            vmem_limit_bytes=32 * 1024 * 1024),
    )(x_emb, w1, s1, t1, w2, s2, t2, w3, s3, t3,
      p["proj_w"], p["proj_b"], pos, p["alpha"])


def transformer_layers(x, sp, heads):
    """All L layers in one pallas_call; weights streamed per l grid step."""
    B, T, H = x.shape
    L = sp["wqkv"].shape[0]
    x_out, attn = pl.pallas_call(
        _layers_kernel,
        out_shape=(jax.ShapeDtypeStruct((B, T, H), x.dtype),
                   jax.ShapeDtypeStruct((L * heads, B, T, T), jnp.bfloat16)),
        grid_spec=pltpu.PrefetchScalarGridSpec(
            num_scalar_prefetch=0, grid=(B, L),
            in_specs=[
                pl.BlockSpec((1, T, H), lambda b, l: (b, 0, 0)),      # x (l==0)
                pl.BlockSpec((1, H, 3 * H), lambda b, l: (l, 0, 0)),  # wqkv
                pl.BlockSpec((1, H, H), lambda b, l: (l, 0, 0)),      # wf_top
                pl.BlockSpec((1, H, H), lambda b, l: (l, 0, 0)),      # wf_bot
                pl.BlockSpec((1, 1, H), lambda b, l: (l, 0, 0)),      # bf
                pl.BlockSpec((1, 1, H), lambda b, l: (l, 0, 0)),      # ln1 gamma
                pl.BlockSpec((1, 1, H), lambda b, l: (l, 0, 0)),      # ln1 beta
                pl.BlockSpec((1, H, 4 * H), lambda b, l: (l, 0, 0)),  # w1
                pl.BlockSpec((1, 1, 4 * H), lambda b, l: (l, 0, 0)),  # b1
                pl.BlockSpec((1, 4 * H, H), lambda b, l: (l, 0, 0)),  # w2
                pl.BlockSpec((1, 1, H), lambda b, l: (l, 0, 0)),      # b2
                pl.BlockSpec((1, 1, H), lambda b, l: (l, 0, 0)),      # ln2 gamma
                pl.BlockSpec((1, 1, H), lambda b, l: (l, 0, 0)),      # ln2 beta
            ],
            out_specs=[
                # same block for every l -> resident activation carry across L
                pl.BlockSpec((1, T, H), lambda b, l: (b, 0, 0)),
                pl.BlockSpec((heads, 1, T, T), lambda b, l: (l, b, 0, 0)),
            ],
            scratch_shapes=[pltpu.VMEM((T, H), jnp.float32)],
        ),
        compiler_params=pltpu.CompilerParams(
            dimension_semantics=("parallel", "arbitrary"),
            vmem_limit_bytes=64 * 1024 * 1024),
    )(x, sp["wqkv"], sp["wfx"], sp["wfr"], sp["bf"], sp["ln1_g"], sp["ln1_b"],
      sp["w1"], sp["b1"], sp["w2"], sp["b2"], sp["ln2_g"], sp["ln2_b"])
    # attn is (L*heads, B, T, T), heads-major per layer; slicing/reshape are views.
    attns = [attn[l * heads:(l + 1) * heads].reshape(heads * B, T, T)
             for l in range(L)]
    return x_out, attns


# ----------------------------------------------------------------------------
# Parameter construction / glue (plain JAX)
# ----------------------------------------------------------------------------

def get_sinusoid_encoding_table(n_position, d_hid, padding_idx=None):
    position = jnp.arange(n_position, dtype=jnp.float32)[:, None]
    hid = jnp.arange(d_hid)
    rates = 1.0 / jnp.power(
        10000.0, (2 * (hid // 2)).astype(jnp.float32) / float(d_hid))
    angles = position * rates[None, :]
    table = jnp.where(hid[None, :] % 2 == 0, jnp.sin(angles), jnp.cos(angles))
    if padding_idx is not None:
        table = table.at[padding_idx].set(0.0)
    return table.astype(jnp.float32)


def init_params(key, vocab_size, embed_dim, hidden, heads, layers):
    def nrm(k, shape, scale=0.05):
        return (scale * jax.random.normal(k, shape)).astype(jnp.float32)

    keys = iter(jax.random.split(key, 128))
    p = {}
    p["alpha"] = jnp.ones((1, 1), jnp.float32)
    embed = nrm(next(keys), (vocab_size, embed_dim))
    p["embed"] = embed.at[0].set(0.0)                      # padding_idx=0
    p["pos_table"] = get_sinusoid_encoding_table(3501, hidden, padding_idx=0)

    # encoder prenet: 3x (conv k=5 + BN + relu) + projection linear.
    # BN eval fold (gamma=1, beta=0, running mean=0, var=1): scale=1/sqrt(1+eps),
    # shift = conv_bias * scale.  (With a trained checkpoint, fold real stats.)
    dims = [(embed_dim, hidden), (hidden, hidden), (hidden, hidden)]
    p["prenet_convs"] = []
    eps = 1e-5
    for cin, cout in dims:
        w = nrm(next(keys), (5, cin, cout))
        b = nrm(next(keys), (cout,))
        scale = (jnp.ones((cout,)) / jnp.sqrt(1.0 + eps)).astype(jnp.float32)
        shift = (b * scale).astype(jnp.float32)
        # repacked for the im2col matmul: row index = k*cin + c
        p["prenet_convs"].append((w.reshape(5 * cin, cout).astype(jnp.bfloat16),
                                  scale[None, :], shift[None, :]))
    p["proj_w"] = nrm(next(keys), (hidden, hidden)).astype(jnp.bfloat16)
    p["proj_b"] = nrm(next(keys), (hidden,))[None, :]

    d = hidden // heads
    inv_sqrt_d = 1.0 / math.sqrt(d)
    per_layer = []
    for _ in range(layers):
        wq = nrm(next(keys), (hidden, hidden)) * inv_sqrt_d   # fold 1/sqrt(d)
        wk = nrm(next(keys), (hidden, hidden))
        wv = nrm(next(keys), (hidden, hidden))
        wf = nrm(next(keys), (2 * hidden, hidden))
        per_layer.append({
            "wqkv": jnp.concatenate([wq, wk, wv], axis=1).astype(jnp.bfloat16),
            "wfx": wf[:hidden].astype(jnp.bfloat16),
            "wfr": wf[hidden:].astype(jnp.bfloat16),
            "bf": nrm(next(keys), (hidden,))[None, :],
            "ln1_g": jnp.ones((1, hidden), jnp.float32),
            "ln1_b": jnp.zeros((1, hidden), jnp.float32),
            "w1": nrm(next(keys), (hidden, 4 * hidden)).astype(jnp.bfloat16),
            "b1": nrm(next(keys), (4 * hidden,))[None, :],
            "w2": nrm(next(keys), (4 * hidden, hidden)).astype(jnp.bfloat16),
            "b2": nrm(next(keys), (hidden,))[None, :],
            "ln2_g": jnp.ones((1, hidden), jnp.float32),
            "ln2_b": jnp.zeros((1, hidden), jnp.float32),
        })
    # Stack with a leading L axis so the fused-layers grid can stream them.
    p["layers_stacked"] = {k: jnp.stack([lp[k] for lp in per_layer], axis=0)
                           for k in per_layer[0]}
    return p


def bert_forward(params, x_ids, pos_ids, heads):
    # eval-mode semantics: masks are None, dropouts are identity.
    x = jnp.take(params["embed"], x_ids, axis=0)           # [B, T, E]
    pos = jnp.take(params["pos_table"], pos_ids, axis=0)   # [B, T, H]
    x = encoder_prenet(x, pos, params)                     # fused prenet, bf16 out
    x, attns = transformer_layers(x, params["layers_stacked"], heads)
    return x, attns


# ----------------------------------------------------------------------------
# Main
# ----------------------------------------------------------------------------

if __name__ == "__main__":
    B, T = 2, 8
    embed_dim, hidden = 32, 32
    heads, layers = 4, 2          # hp.attn_heads / hp.attn_layers (small config)
    vocab_size = 40

    key = jax.random.PRNGKey(0)
    pkey, xkey = jax.random.split(key)
    params = init_params(pkey, vocab_size, embed_dim, hidden, heads, layers)

    x_ids = jax.random.randint(xkey, (B, T), 1, vocab_size, dtype=jnp.int32)
    pos_ids = jnp.tile(jnp.arange(1, T + 1, dtype=jnp.int32)[None, :], (B, 1))

    out, attns = bert_forward(params, x_ids, pos_ids, heads)
    jax.block_until_ready(out)
    for a in attns:
        jax.block_until_ready(a)

    assert out.shape == (B, T, hidden)
    assert all(a.shape == (heads * B, T, T) for a in attns)
    # TODO(synk): training-mode branch (padding masks + stochastic dropout) not
    # implemented; this script reproduces eval/inference semantics.
    print("KERNEL_OK")
</pallas_src>

<mosaic_0001>
module attributes {stable_mosaic.version = 11 : i64} {
  func.func @_prenet_kernel(%arg0: i32, %arg1: memref<1x8x32xf32, #tpu.memory_space<vmem>>, %arg2: memref<160x32xbf16, #tpu.memory_space<vmem>>, %arg3: memref<1x32xf32, #tpu.memory_space<vmem>>, %arg4: memref<1x32xf32, #tpu.memory_space<vmem>>, %arg5: memref<160x32xbf16, #tpu.memory_space<vmem>>, %arg6: memref<1x32xf32, #tpu.memory_space<vmem>>, %arg7: memref<1x32xf32, #tpu.memory_space<vmem>>, %arg8: memref<160x32xbf16, #tpu.memory_space<vmem>>, %arg9: memref<1x32xf32, #tpu.memory_space<vmem>>, %arg10: memref<1x32xf32, #tpu.memory_space<vmem>>, %arg11: memref<32x32xbf16, #tpu.memory_space<vmem>>, %arg12: memref<1x32xf32, #tpu.memory_space<vmem>>, %arg13: memref<1x8x32xf32, #tpu.memory_space<vmem>>, %arg14: memref<1x1xf32, #tpu.memory_space<smem>>, %arg15: memref<1x8x32xbf16, #tpu.memory_space<vmem>>, %arg16: memref<12x32xf32, #tpu.memory_space<vmem>>, %arg17: memref<8x160xbf16, #tpu.memory_space<vmem>>) attributes {dimension_semantics = [#tpu.dimension_semantics<parallel>], iteration_bounds = array<i64: 2>, scalar_prefetch = 0 : i64, scratch_operands = 2 : i64, tpu.core_type = #tpu.core_type<tc>, window_params = [{transform_indices = @transform_0, window_bounds = array<i64: 1, 8, 32>}, {pipeline_mode = #tpu.pipeline_mode<synchronous>, transform_indices = @transform_1, window_bounds = array<i64: 160, 32>}, {pipeline_mode = #tpu.pipeline_mode<synchronous>, transform_indices = @transform_2, window_bounds = array<i64: 1, 32>}, {pipeline_mode = #tpu.pipeline_mode<synchronous>, transform_indices = @transform_3, window_bounds = array<i64: 1, 32>}, {pipeline_mode = #tpu.pipeline_mode<synchronous>, transform_indices = @transform_4, window_bounds = array<i64: 160, 32>}, {pipeline_mode = #tpu.pipeline_mode<synchronous>, transform_indices = @transform_5, window_bounds = array<i64: 1, 32>}, {pipeline_mode = #tpu.pipeline_mode<synchronous>, transform_indices = @transform_6, window_bounds = array<i64: 1, 32>}, {pipeline_mode = #tpu.pipeline_mode<synchronous>, transform_indices = @transform_7, window_bounds = array<i64: 160, 32>}, {pipeline_mode = #tpu.pipeline_mode<synchronous>, transform_indices = @transform_8, window_bounds = array<i64: 1, 32>}, {pipeline_mode = #tpu.pipeline_mode<synchronous>, transform_indices = @transform_9, window_bounds = array<i64: 1, 32>}, {pipeline_mode = #tpu.pipeline_mode<synchronous>, transform_indices = @transform_10, window_bounds = array<i64: 32, 32>}, {pipeline_mode = #tpu.pipeline_mode<synchronous>, transform_indices = @transform_11, window_bounds = array<i64: 1, 32>}, {transform_indices = @transform_12, window_bounds = array<i64: 1, 8, 32>}, {transform_indices = @transform_13, window_bounds = array<i64: 1, 1>}, {transform_indices = @transform_14, window_bounds = array<i64: 1, 8, 32>}]} {
    %cst = arith.constant 0.000000e+00 : f32
    %0 = vector.broadcast %cst : f32 to vector<12x32xf32>
    %c0 = arith.constant 0 : index
    %c0_0 = arith.constant 0 : index
    %1 = vector.load %arg16[%c0, %c0_0] : memref<12x32xf32, #tpu.memory_space<vmem>>, vector<12x32xf32>
    tpu.vector_store %arg16[%c0, %c0_0], %0 {strides = array<i32>} : memref<12x32xf32, #tpu.memory_space<vmem>>, vector<12x32xf32>,
    %c0_1 = arith.constant 0 : index
    %c0_2 = arith.constant 0 : index
    %c0_3 = arith.constant 0 : index
    %2 = vector.load %arg1[%c0_1, %c0_2, %c0_3] : memref<1x8x32xf32, #tpu.memory_space<vmem>>, vector<1x8x32xf32>
    %3 = vector.shape_cast %2 : vector<1x8x32xf32> to vector<8x32xf32>
    %c0_4 = arith.constant 0 : index
    %c0_5 = arith.constant 0 : index
    %4 = vector.load %arg3[%c0_4, %c0_5] : memref<1x32xf32, #tpu.memory_space<vmem>>, vector<1x32xf32>
    %5 = vector.shape_cast %4 : vector<1x32xf32> to vector<32xf32>
    %c0_6 = arith.constant 0 : index
    %c0_7 = arith.constant 0 : index
    %6 = vector.load %arg4[%c0_6, %c0_7] : memref<1x32xf32, #tpu.memory_space<vmem>>, vector<1x32xf32>
    %7 = vector.shape_cast %6 : vector<1x32xf32> to vector<32xf32>
    %c2 = arith.constant 2 : index
    %c0_8 = arith.constant 0 : index
    %8 = vector.load %arg16[%c2, %c0_8] : memref<12x32xf32, #tpu.memory_space<vmem>>, vector<8x32xf32>
    tpu.vector_store %arg16[%c2, %c0_8], %3 {strides = array<i32>} : memref<12x32xf32, #tpu.memory_space<vmem>>, vector<8x32xf32>,
    %c0_9 = arith.constant 0 : index
    %c0_10 = arith.constant 0 : index
    %9 = vector.load %arg16[%c0_9, %c0_10] : memref<12x32xf32, #tpu.memory_space<vmem>>, vector<8x32xf32>
    %10 = arith.truncf %9 : vector<8x32xf32> to vector<8x32xbf16>
    %c0_11 = arith.constant 0 : index
    %c0_12 = arith.constant 0 : index
    %11 = vector.load %arg17[%c0_11, %c0_12] : memref<8x160xbf16, #tpu.memory_space<vmem>>, vector<8x32xbf16>
    tpu.vector_store %arg17[%c0_11, %c0_12], %10 {strides = array<i32>} : memref<8x160xbf16, #tpu.memory_space<vmem>>, vector<8x32xbf16>,
    %c1 = arith.constant 1 : index
    %c0_13 = arith.constant 0 : index
    %12 = vector.load %arg16[%c1, %c0_13] : memref<12x32xf32, #tpu.memory_space<vmem>>, vector<8x32xf32>
    %13 = arith.truncf %12 : vector<8x32xf32> to vector<8x32xbf16>
    %c0_14 = arith.constant 0 : index
    %c32 = arith.constant 32 : index
    %14 = vector.load %arg17[%c0_14, %c32] : memref<8x160xbf16, #tpu.memory_space<vmem>>, vector<8x32xbf16>
    tpu.vector_store %arg17[%c0_14, %c32], %13 {strides = array<i32>} : memref<8x160xbf16, #tpu.memory_space<vmem>>, vector<8x32xbf16>,
    %c2_15 = arith.constant 2 : index
    %c0_16 = arith.constant 0 : index
    %15 = vector.load %arg16[%c2_15, %c0_16] : memref<12x32xf32, #tpu.memory_space<vmem>>, vector<8x32xf32>
    %16 = arith.truncf %15 : vector<8x32xf32> to vector<8x32xbf16>
    %c0_17 = arith.constant 0 : index
    %c64 = arith.constant 64 : index
    %17 = vector.load %arg17[%c0_17, %c64] : memref<8x160xbf16, #tpu.memory_space<vmem>>, vector<8x32xbf16>
    tpu.vector_store %arg17[%c0_17, %c64], %16 {strides = array<i32>} : memref<8x160xbf16, #tpu.memory_space<vmem>>, vector<8x32xbf16>,
    %c3 = arith.constant 3 : index
    %c0_18 = arith.constant 0 : index
    %18 = vector.load %arg16[%c3, %c0_18] : memref<12x32xf32, #tpu.memory_space<vmem>>, vector<8x32xf32>
    %19 = arith.truncf %18 : vector<8x32xf32> to vector<8x32xbf16>
    %c0_19 = arith.constant 0 : index
    %c96 = arith.constant 96 : index
    %20 = vector.load %arg17[%c0_19, %c96] : memref<8x160xbf16, #tpu.memory_space<vmem>>, vector<8x32xbf16>
    tpu.vector_store %arg17[%c0_19, %c96], %19 {strides = array<i32>} : memref<8x160xbf16, #tpu.memory_space<vmem>>, vector<8x32xbf16>,
    %c4 = arith.constant 4 : index
    %c0_20 = arith.constant 0 : index
    %21 = vector.load %arg16[%c4, %c0_20] : memref<12x32xf32, #tpu.memory_space<vmem>>, vector<8x32xf32>
    %22 = arith.truncf %21 : vector<8x32xf32> to vector<8x32xbf16>
    %c0_21 = arith.constant 0 : index
    %c128 = arith.constant 128 : index
    %23 = vector.load %arg17[%c0_21, %c128] : memref<8x160xbf16, #tpu.memory_space<vmem>>, vector<8x32xbf16>
    tpu.vector_store %arg17[%c0_21, %c128], %22 {strides = array<i32>} : memref<8x160xbf16, #tpu.memory_space<vmem>>, vector<8x32xbf16>,
    %c0_22 = arith.constant 0 : index
    %c0_23 = arith.constant 0 : index
    %24 = vector.load %arg17[%c0_22, %c0_23] : memref<8x160xbf16, #tpu.memory_space<vmem>>, vector<8x160xbf16>
    %c0_24 = arith.constant 0 : index
    %c0_25 = arith.constant 0 : index
    %25 = vector.load %arg2[%c0_24, %c0_25] : memref<160x32xbf16, #tpu.memory_space<vmem>>, vector<160x32xbf16>
    %cst_26 = arith.constant dense<0.000000e+00> : vector<8x32xf32>
    %26 = tpu.matmul %24, %25, %cst_26 {dimension_numbers = #tpu.dot_dimension_numbers<[1], [0], [0], [1], [0, 0, 1, 1], [], []>} : vector<8x160xbf16>, vector<160x32xbf16>, vector<8x32xf32> -> vector<8x32xf32>
    %27 = vector.shape_cast %5 : vector<32xf32> to vector<1x32xf32>
    %28 = vector.broadcast %27 : vector<1x32xf32> to vector<8x32xf32>
    %29 = arith.mulf %26, %28 : vector<8x32xf32>
    %30 = vector.shape_cast %7 : vector<32xf32> to vector<1x32xf32>
    %31 = vector.broadcast %30 : vector<1x32xf32> to vector<8x32xf32>
    %32 = arith.addf %29, %31 : vector<8x32xf32>
    %cst_27 = arith.constant 0.000000e+00 : f32
    %33 = vector.broadcast %cst_27 : f32 to vector<8x32xf32>
    %34 = arith.maximumf %32, %33 : vector<8x32xf32>
    %c0_28 = arith.constant 0 : index
    %c0_29 = arith.constant 0 : index
    %35 = vector.load %arg6[%c0_28, %c0_29] : memref<1x32xf32, #tpu.memory_space<vmem>>, vector<1x32xf32>
    %36 = vector.shape_cast %35 : vector<1x32xf32> to vector<32xf32>
    %c0_30 = arith.constant 0 : index
    %c0_31 = arith.constant 0 : index
    %37 = vector.load %arg7[%c0_30, %c0_31] : memref<1x32xf32, #tpu.memory_space<vmem>>, vector<1x32xf32>
    %38 = vector.shape_cast %37 : vector<1x32xf32> to vector<32xf32>
    %c2_32 = arith.constant 2 : index
    %c0_33 = arith.constant 0 : index
    %39 = vector.load %arg16[%c2_32, %c0_33] : memref<12x32xf32, #tpu.memory_space<vmem>>, vector<8x32xf32>
    tpu.vector_store %arg16[%c2_32, %c0_33], %34 {strides = array<i32>} : memref<12x32xf32, #tpu.memory_space<vmem>>, vector<8x32xf32>,
    %c0_34 = arith.constant 0 : index
    %c0_35 = arith.constant 0 : index
    %40 = vector.load %arg16[%c0_34, %c0_35] : memref<12x32xf32, #tpu.memory_space<vmem>>, vector<8x32xf32>
    %41 = arith.truncf %40 : vector<8x32xf32> to vector<8x32xbf16>
    %c0_36 = arith.constant 0 : index
    %c0_37 = arith.constant 0 : index
    %42 = vector.load %arg17[%c0_36, %c0_37] : memref<8x160xbf16, #tpu.memory_space<vmem>>, vector<8x32xbf16>
    tpu.vector_store %arg17[%c0_36, %c0_37], %41 {strides = array<i32>} : memref<8x160xbf16, #tpu.memory_space<vmem>>, vector<8x32xbf16>,
    %c1_38 = arith.constant 1 : index
    %c0_39 = arith.constant 0 : index
    %43 = vector.load %arg16[%c1_38, %c0_39] : memref<12x32xf32, #tpu.memory_space<vmem>>, vector<8x32xf32>
    %44 = arith.truncf %43 : vector<8x32xf32> to vector<8x32xbf16>
    %c0_40 = arith.constant 0 : index
    %c32_41 = arith.constant 32 : index
    %45 = vector.load %arg17[%c0_40, %c32_41] : memref<8x160xbf16, #tpu.memory_space<vmem>>, vector<8x32xbf16>
    tpu.vector_store %arg17[%c0_40, %c32_41], %44 {strides = array<i32>} : memref<8x160xbf16, #tpu.memory_space<vmem>>, vector<8x32xbf16>,
    %c2_42 = arith.constant 2 : index
    %c0_43 = arith.constant 0 : index
    %46 = vector.load %arg16[%c2_42, %c0_43] : memref<12x32xf32, #tpu.memory_space<vmem>>, vector<8x32xf32>
    %47 = arith.truncf %46 : vector<8x32xf32> to vector<8x32xbf16>
    %c0_44 = arith.constant 0 : index
    %c64_45 = arith.constant 64 : index
    %48 = vector.load %arg17[%c0_44, %c64_45] : memref<8x160xbf16, #tpu.memory_space<vmem>>, vector<8x32xbf16>
    tpu.vector_store %arg17[%c0_44, %c64_45], %47 {strides = array<i32>} : memref<8x160xbf16, #tpu.memory_space<vmem>>, vector<8x32xbf16>,
    %c3_46 = arith.constant 3 : index
    %c0_47 = arith.constant 0 : index
    %49 = vector.load %arg16[%c3_46, %c0_47] : memref<12x32xf32, #tpu.memory_space<vmem>>, vector<8x32xf32>
    %50 = arith.truncf %49 : vector<8x32xf32> to vector<8x32xbf16>
    %c0_48 = arith.constant 0 : index
    %c96_49 = arith.constant 96 : index
    %51 = vector.load %arg17[%c0_48, %c96_49] : memref<8x160xbf16, #tpu.memory_space<vmem>>, vector<8x32xbf16>
    tpu.vector_store %arg17[%c0_48, %c96_49], %50 {strides = array<i32>} : memref<8x160xbf16, #tpu.memory_space<vmem>>, vector<8x32xbf16>,
    %c4_50 = arith.constant 4 : index
    %c0_51 = arith.constant 0 : index
    %52 = vector.load %arg16[%c4_50, %c0_51] : memref<12x32xf32, #tpu.memory_space<vmem>>, vector<8x32xf32>
    %53 = arith.truncf %52 : vector<8x32xf32> to vector<8x32xbf16>
    %c0_52 = arith.constant 0 : index
    %c128_53 = arith.constant 128 : index
    %54 = vector.load %arg17[%c0_52, %c128_53] : memref<8x160xbf16, #tpu.memory_space<vmem>>, vector<8x32xbf16>
    tpu.vector_store %arg17[%c0_52, %c128_53], %53 {strides = array<i32>} : memref<8x160xbf16, #tpu.memory_space<vmem>>, vector<8x32xbf16>,
    %c0_54 = arith.constant 0 : index
    %c0_55 = arith.constant 0 : index
    %55 = vector.load %arg17[%c0_54, %c0_55] : memref<8x160xbf16, #tpu.memory_space<vmem>>, vector<8x160xbf16>
    %c0_56 = arith.constant 0 : index
    %c0_57 = arith.constant 0 : index
    %56 = vector.load %arg5[%c0_56, %c0_57] : memref<160x32xbf16, #tpu.memory_space<vmem>>, vector<160x32xbf16>
    %cst_58 = arith.constant dense<0.000000e+00> : vector<8x32xf32>
    %57 = tpu.matmul %55, %56, %cst_58 {dimension_numbers = #tpu.dot_dimension_numbers<[1], [0], [0], [1], [0, 0, 1, 1], [], []>} : vector<8x160xbf16>, vector<160x32xbf16>, vector<8x32xf32> -> vector<8x32xf32>
    %58 = vector.shape_cast %36 : vector<32xf32> to vector<1x32xf32>
    %59 = vector.broadcast %58 : vector<1x32xf32> to vector<8x32xf32>
    %60 = arith.mulf %57, %59 : vector<8x32xf32>
    %61 = vector.shape_cast %38 : vector<32xf32> to vector<1x32xf32>
    %62 = vector.broadcast %61 : vector<1x32xf32> to vector<8x32xf32>
    %63 = arith.addf %60, %62 : vector<8x32xf32>
    %cst_59 = arith.constant 0.000000e+00 : f32
    %64 = vector.broadcast %cst_59 : f32 to vector<8x32xf32>
    %65 = arith.maximumf %63, %64 : vector<8x32xf32>
    %c0_60 = arith.constant 0 : index
    %c0_61 = arith.constant 0 : index
    %66 = vector.load %arg9[%c0_60, %c0_61] : memref<1x32xf32, #tpu.memory_space<vmem>>, vector<1x32xf32>
    %67 = vector.shape_cast %66 : vector<1x32xf32> to vector<32xf32>
    %c0_62 = arith.constant 0 : index
    %c0_63 = arith.constant 0 : index
    %68 = vector.load %arg10[%c0_62, %c0_63] : memref<1x32xf32, #tpu.memory_space<vmem>>, vector<1x32xf32>
    %69 = vector.shape_cast %68 : vector<1x32xf32> to vector<32xf32>
    %c2_64 = arith.constant 2 : index
    %c0_65 = arith.constant 0 : index
    %70 = vector.load %arg16[%c2_64, %c0_65] : memref<12x32xf32, #tpu.memory_space<vmem>>, vector<8x32xf32>
    tpu.vector_store %arg16[%c2_64, %c0_65], %65 {strides = array<i32>} : memref<12x32xf32, #tpu.memory_space<vmem>>, vector<8x32xf32>,
    %c0_66 = arith.constant 0 : index
    %c0_67 = arith.constant 0 : index
    %71 = vector.load %arg16[%c0_66, %c0_67] : memref<12x32xf32, #tpu.memory_space<vmem>>, vector<8x32xf32>
    %72 = arith.truncf %71 : vector<8x32xf32> to vector<8x32xbf16>
    %c0_68 = arith.constant 0 : index
    %c0_69 = arith.constant 0 : index
    %73 = vector.load %arg17[%c0_68, %c0_69] : memref<8x160xbf16, #tpu.memory_space<vmem>>, vector<8x32xbf16>
    tpu.vector_store %arg17[%c0_68, %c0_69], %72 {strides = array<i32>} : memref<8x160xbf16, #tpu.memory_space<vmem>>, vector<8x32xbf16>,
    %c1_70 = arith.constant 1 : index
    %c0_71 = arith.constant 0 : index
    %74 = vector.load %arg16[%c1_70, %c0_71] : memref<12x32xf32, #tpu.memory_space<vmem>>, vector<8x32xf32>
    %75 = arith.truncf %74 : vector<8x32xf32> to vector<8x32xbf16>
    %c0_72 = arith.constant 0 : index
    %c32_73 = arith.constant 32 : index
    %76 = vector.load %arg17[%c0_72, %c32_73] : memref<8x160xbf16, #tpu.memory_space<vmem>>, vector<8x32xbf16>
    tpu.vector_store %arg17[%c0_72, %c32_73], %75 {strides = array<i32>} : memref<8x160xbf16, #tpu.memory_space<vmem>>, vector<8x32xbf16>,
    %c2_74 = arith.constant 2 : index
    %c0_75 = arith.constant 0 : index
    %77 = vector.load %arg16[%c2_74, %c0_75] : memref<12x32xf32, #tpu.memory_space<vmem>>, vector<8x32xf32>
    %78 = arith.truncf %77 : vector<8x32xf32> to vector<8x32xbf16>
    %c0_76 = arith.constant 0 : index
    %c64_77 = arith.constant 64 : index
    %79 = vector.load %arg17[%c0_76, %c64_77] : memref<8x160xbf16, #tpu.memory_space<vmem>>, vector<8x32xbf16>
    tpu.vector_store %arg17[%c0_76, %c64_77], %78 {strides = array<i32>} : memref<8x160xbf16, #tpu.memory_space<vmem>>, vector<8x32xbf16>,
    %c3_78 = arith.constant 3 : index
    %c0_79 = arith.constant 0 : index
    %80 = vector.load %arg16[%c3_78, %c0_79] : memref<12x32xf32, #tpu.memory_space<vmem>>, vector<8x32xf32>
    %81 = arith.truncf %80 : vector<8x32xf32> to vector<8x32xbf16>
    %c0_80 = arith.constant 0 : index
    %c96_81 = arith.constant 96 : index
    %82 = vector.load %arg17[%c0_80, %c96_81] : memref<8x160xbf16, #tpu.memory_space<vmem>>, vector<8x32xbf16>
    tpu.vector_store %arg17[%c0_80, %c96_81], %81 {strides = array<i32>} : memref<8x160xbf16, #tpu.memory_space<vmem>>, vector<8x32xbf16>,
    %c4_82 = arith.constant 4 : index
    %c0_83 = arith.constant 0 : index
    %83 = vector.load %arg16[%c4_82, %c0_83] : memref<12x32xf32, #tpu.memory_space<vmem>>, vector<8x32xf32>
    %84 = arith.truncf %83 : vector<8x32xf32> to vector<8x32xbf16>
    %c0_84 = arith.constant 0 : index
    %c128_85 = arith.constant 128 : index
    %85 = vector.load %arg17[%c0_84, %c128_85] : memref<8x160xbf16, #tpu.memory_space<vmem>>, vector<8x32xbf16>
    tpu.vector_store %arg17[%c0_84, %c128_85], %84 {strides = array<i32>} : memref<8x160xbf16, #tpu.memory_space<vmem>>, vector<8x32xbf16>,
    %c0_86 = arith.constant 0 : index
    %c0_87 = arith.constant 0 : index
    %86 = vector.load %arg17[%c0_86, %c0_87] : memref<8x160xbf16, #tpu.memory_space<vmem>>, vector<8x160xbf16>
    %c0_88 = arith.constant 0 : index
    %c0_89 = arith.constant 0 : index
    %87 = vector.load %arg8[%c0_88, %c0_89] : memref<160x32xbf16, #tpu.memory_space<vmem>>, vector<160x32xbf16>
    %cst_90 = arith.constant dense<0.000000e+00> : vector<8x32xf32>
    %88 = tpu.matmul %86, %87, %cst_90 {dimension_numbers = #tpu.dot_dimension_numbers<[1], [0], [0], [1], [0, 0, 1, 1], [], []>} : vector<8x160xbf16>, vector<160x32xbf16>, vector<8x32xf32> -> vector<8x32xf32>
    %89 = vector.shape_cast %67 : vector<32xf32> to vector<1x32xf32>
    %90 = vector.broadcast %89 : vector<1x32xf32> to vector<8x32xf32>
    %91 = arith.mulf %88, %90 : vector<8x32xf32>
    %92 = vector.shape_cast %69 : vector<32xf32> to vector<1x32xf32>
    %93 = vector.broadcast %92 : vector<1x32xf32> to vector<8x32xf32>
    %94 = arith.addf %91, %93 : vector<8x32xf32>
    %cst_91 = arith.constant 0.000000e+00 : f32
    %95 = vector.broadcast %cst_91 : f32 to vector<8x32xf32>
    %96 = arith.maximumf %94, %95 : vector<8x32xf32>
    %97 = arith.truncf %96 : vector<8x32xf32> to vector<8x32xbf16>
    %c0_92 = arith.constant 0 : index
    %c0_93 = arith.constant 0 : index
    %98 = vector.load %arg11[%c0_92, %c0_93] : memref<32x32xbf16, #tpu.memory_space<vmem>>, vector<32x32xbf16>
    %cst_94 = arith.constant dense<0.000000e+00> : vector<8x32xf32>
    %99 = tpu.matmul %97, %98, %cst_94 {dimension_numbers = #tpu.dot_dimension_numbers<[1], [0], [0], [1], [0, 0, 1, 1], [], []>} : vector<8x32xbf16>, vector<32x32xbf16>, vector<8x32xf32> -> vector<8x32xf32>
    %c0_95 = arith.constant 0 : index
    %c0_96 = arith.constant 0 : index
    %100 = vector.load %arg12[%c0_95, %c0_96] : memref<1x32xf32, #tpu.memory_space<vmem>>, vector<1x32xf32>
    %101 = vector.shape_cast %100 : vector<1x32xf32> to vector<32xf32>
    %102 = vector.shape_cast %101 : vector<32xf32> to vector<1x32xf32>
    %103 = vector.broadcast %102 : vector<1x32xf32> to vector<8x32xf32>
    %104 = arith.addf %99, %103 : vector<8x32xf32>
    %c0_97 = arith.constant 0 : index
    %c0_98 = arith.constant 0 : index
    %c0_99 = arith.constant 0 : index
    %105 = vector.load %arg13[%c0_97, %c0_98, %c0_99] : memref<1x8x32xf32, #tpu.memory_space<vmem>>, vector<1x8x32xf32>
    %106 = vector.shape_cast %105 : vector<1x8x32xf32> to vector<8x32xf32>
    %c0_100 = arith.constant 0 : index
    %c0_101 = arith.constant 0 : index
    %107 = memref.load %arg14[%c0_100, %c0_101] : memref<1x1xf32, #tpu.memory_space<smem>>
    %108 = vector.broadcast %107 : f32 to vector<8x32xf32>
    %109 = arith.mulf %106, %108 : vector<8x32xf32>
    %110 = arith.addf %109, %104 : vector<8x32xf32>
    %111 = arith.truncf %110 : vector<8x32xf32> to vector<8x32xbf16>
    %c0_102 = arith.constant 0 : index
    %c0_103 = arith.constant 0 : index
    %c0_104 = arith.constant 0 : index
    %112 = vector.load %arg15[%c0_102, %c0_103, %c0_104] : memref<1x8x32xbf16, #tpu.memory_space<vmem>>, vector<1x8x32xbf16>
    %113 = vector.shape_cast %112 : vector<1x8x32xbf16> to vector<8x32xbf16>
    %114 = vector.shape_cast %111 : vector<8x32xbf16> to vector<1x8x32xbf16>
    tpu.vector_store %arg15[%c0_102, %c0_103, %c0_104], %114 {strides = array<i32>} : memref<1x8x32xbf16, #tpu.memory_space<vmem>>, vector<1x8x32xbf16>,
    return
  }
  func.func @transform_0(%arg0: i32) -> (i32, i32, i32) {
    %c0_i32 = arith.constant 0 : i32
    %c0_i32_0 = arith.constant 0 : i32
    %c0_i32_1 = arith.constant 0 : i32
    return %arg0, %c0_i32, %c0_i32_0 : i32, i32, i32
  }
  func.func @transform_1(%arg0: i32) -> (i32, i32) {
    %c0_i32 = arith.constant 0 : i32
    %c0_i32_0 = arith.constant 0 : i32
    %c0_i32_1 = arith.constant 0 : i32
    return %c0_i32, %c0_i32_0 : i32, i32
  }
  func.func @transform_2(%arg0: i32) -> (i32, i32) {
    %c0_i32 = arith.constant 0 : i32
    %c0_i32_0 = arith.constant 0 : i32
    %c0_i32_1 = arith.constant 0 : i32
    return %c0_i32, %c0_i32_0 : i32, i32
  }
  func.func @transform_3(%arg0: i32) -> (i32, i32) {
    %c0_i32 = arith.constant 0 : i32
    %c0_i32_0 = arith.constant 0 : i32
    %c0_i32_1 = arith.constant 0 : i32
    return %c0_i32, %c0_i32_0 : i32, i32
  }
  func.func @transform_4(%arg0: i32) -> (i32, i32) {
    %c0_i32 = arith.constant 0 : i32
    %c0_i32_0 = arith.constant 0 : i32
    %c0_i32_1 = arith.constant 0 : i32
    return %c0_i32, %c0_i32_0 : i32, i32
  }
  func.func @transform_5(%arg0: i32) -> (i32, i32) {
    %c0_i32 = arith.constant 0 : i32
    %c0_i32_0 = arith.constant 0 : i32
    %c0_i32_1 = arith.constant 0 : i32
    return %c0_i32, %c0_i32_0 : i32, i32
  }
  func.func @transform_6(%arg0: i32) -> (i32, i32) {
    %c0_i32 = arith.constant 0 : i32
    %c0_i32_0 = arith.constant 0 : i32
    %c0_i32_1 = arith.constant 0 : i32
    return %c0_i32, %c0_i32_0 : i32, i32
  }
  func.func @transform_7(%arg0: i32) -> (i32, i32) {
    %c0_i32 = arith.constant 0 : i32
    %c0_i32_0 = arith.constant 0 : i32
    %c0_i32_1 = arith.constant 0 : i32
    return %c0_i32, %c0_i32_0 : i32, i32
  }
  func.func @transform_8(%arg0: i32) -> (i32, i32) {
    %c0_i32 = arith.constant 0 : i32
    %c0_i32_0 = arith.constant 0 : i32
    %c0_i32_1 = arith.constant 0 : i32
    return %c0_i32, %c0_i32_0 : i32, i32
  }
  func.func @transform_9(%arg0: i32) -> (i32, i32) {
    %c0_i32 = arith.constant 0 : i32
    %c0_i32_0 = arith.constant 0 : i32
    %c0_i32_1 = arith.constant 0 : i32
    return %c0_i32, %c0_i32_0 : i32, i32
  }
  func.func @transform_10(%arg0: i32) -> (i32, i32) {
    %c0_i32 = arith.constant 0 : i32
    %c0_i32_0 = arith.constant 0 : i32
    %c0_i32_1 = arith.constant 0 : i32
    return %c0_i32, %c0_i32_0 : i32, i32
  }
  func.func @transform_11(%arg0: i32) -> (i32, i32) {
    %c0_i32 = arith.constant 0 : i32
    %c0_i32_0 = arith.constant 0 : i32
    %c0_i32_1 = arith.constant 0 : i32
    return %c0_i32, %c0_i32_0 : i32, i32
  }
  func.func @transform_12(%arg0: i32) -> (i32, i32, i32) {
    %c0_i32 = arith.constant 0 : i32
    %c0_i32_0 = arith.constant 0 : i32
    %c0_i32_1 = arith.constant 0 : i32
    return %arg0, %c0_i32, %c0_i32_0 : i32, i32, i32
  }
  func.func @transform_13(%arg0: i32) -> (i32, i32) {
    %c0_i32 = arith.constant 0 : i32
    %c0_i32_0 = arith.constant 0 : i32
    %c0_i32_1 = arith.constant 0 : i32
    return %c0_i32, %c0_i32_0 : i32, i32
  }
  func.func @transform_14(%arg0: i32) -> (i32, i32, i32) {
    %c0_i32 = arith.constant 0 : i32
    %c0_i32_0 = arith.constant 0 : i32
    %c0_i32_1 = arith.constant 0 : i32
    return %arg0, %c0_i32, %c0_i32_0 : i32, i32, i32
  }
}

</mosaic_0001>

<bundles_post_ra>
// kernel: tpu_custom_call.1
= control target key start
LH: loop header
LB: loop body
LE: loop exit
PB: predicated region body
PF: predicated region fallthrough
CT: control target
= control target key end

     0   :  { %s1809_s0 = inlined_call_operand.vmem [shape: f32[2,8,32], index: 0, kind: input, shape index: {}]   ;;  %s1810_s1 = inlined_call_operand.vmem [shape: bf16[160,32], index: 1, kind: input, shape index: {}]   ;;  %s1811_s2 = inlined_call_operand.vmem [shape: f32[1,32], index: 2, kind: input, shape index: {}]   ;;  %s1812_s3 = inlined_call_operand.vmem [shape: f32[1,32], index: 3, kind: input, shape index: {}]   ;;  %s1813_s4 = inlined_call_operand.vmem [shape: bf16[160,32], index: 4, kind: input, shape index: {}]   ;;  %s1814_s5 = inlined_call_operand.vmem [shape: f32[1,32], index: 5, kind: input, shape index: {}]   ;;  %s1815_s6 = inlined_call_operand.vmem [shape: f32[1,32], index: 6, kind: input, shape index: {}]   ;;  %s1816_s7 = inlined_call_operand.vmem [shape: bf16[160,32], index: 7, kind: input, shape index: {}]   ;;  %s1817_s8 = inlined_call_operand.vmem [shape: f32[1,32], index: 8, kind: input, shape index: {}]   ;;  %s1818_s9 = inlined_call_operand.vmem [shape: f32[1,32], index: 9, kind: input, shape index: {}]   ;;  %s1819_s10 = inlined_call_operand.vmem [shape: bf16[32,32], index: 10, kind: input, shape index: {}]   ;;  %s1820_s11 = inlined_call_operand.vmem [shape: f32[1,32], index: 11, kind: input, shape index: {}]   ;;  %s1821_s12 = inlined_call_operand.vmem [shape: f32[2,8,32], index: 12, kind: input, shape index: {}]   ;;  %s1822_s13 = inlined_call_operand.<no memory space> [shape: f32[1,1], index: 13, kind: input, shape index: {}]   ;;  %s1823_s14 = inlined_call_operand.hbm [shape: bf16[2,8,32], index: 14, kind: output, shape index: {}]  }
   0x1   :  { %1831 = sst [smem:[#allocation10_spill]] %s1809_s0 }
   0x2   :  { %1832 = sst [smem:[#allocation11_spill]] %s1810_s1 }
   0x3   :  { %19 = sst [smem:[#allocation4]] %s1822_s13 }
   0x4   :  { %20 = vsyncpa [#allocation6], 0 }
   0x5   :  { %22 = vsyncpa [#allocation6 + $0x1], 0  ;;  %s1513_s15 = smov 0   ;;  %s1515_s16 = smov 0  }
   0x6   :  { %s1517_s17 = smov 0   ;;  %s1519_s18 = smov 0  }
   0x7 LB: > { %1833 = sst [smem:[#allocation8_spill]] %s1422_s17  ;;  %s1534_s13 = sadd.s32 4294967295, %s1426_s18   ;;  %s1426_s18 = sphi %s1519_s18, %s1848_s18   ;;  %s1422_s17 = sphi %s1517_s17, %s1847_s17   ;;  %s1418_s16 = sphi %s1515_s16, %s1846_s16   ;;  %s1414_s15 = sphi %s1513_s15, %s1845_s15  }
   0x8   : > { %s1192_s19 = sadd.s32 4294967294, %s1426_s18   ;;  %s1538_s20 = sadd.s32 1, %s1426_s18  }
   0x9   : > { %s339_s21 = sadd.s32 1, %s1422_s17  ;;  %s336_s22 = ssub.s32 %s1426_s18, %s1538_s20 }
   0xa   : > { %p349_p0 = scmp.ne.s32.totalorder %s1422_s17, %s1418_s16  ;;  %p337_p1 = scmp.eq.s32.totalorder %s336_s22, 0 }
   0xb   : > { %p350_p2 = scmp.eq.s32.totalorder %s1534_s13, 1  ;;  %p355_p3 = scmp.ne.s32.totalorder %s1418_s16, %s1414_s15 }
   0xc   : > { %p356_p4 = scmp.eq.s32.totalorder %s1192_s19, 1  ;;  %p1195_p7 = scmp.ge.s32.totalorder %s1426_s18, 1 }
   0xd   : > { %s1549_s23 = scalar_select %p337_p1, %s1422_s17, %s339_s21  }
   0xe   : > { %p1551_p5 = por %p350_p2, %p349_p0  ;;  %p1555_p6 = por %p356_p4, %p355_p3 }
   0xf   : > { %1834 = sst [smem:[#allocation9_spill]] %s1549_s23  ;;  %p424_p8 = scmp.lt.s32.totalorder %s1426_s18, 3 }
  0x11   : > { %p425_p9 = pnand %p1195_p7, %p424_p8 }
  0x12   : > { %p473_p10 = scmp.lt.s32.totalorder (!%p425_p9), %s1534_s13, 1  ;;  %vm482_vm0 = vcmask (!%p425_p9), 261120   ;;  %vm484_vm1 = vcmask (!%p425_p9), 257024   ;;  %v1428_v0 = vmov (!%p425_p9), 0.0   ;;  %v1429_v1 = vmov (!%p425_p9), 0   ;;  %s1837_s1 = sld [smem:[#allocation11_spill]] (!%p425_p9) }
  0x13   : > { %428 = sbr.rel (%p425_p9) target bundleno = 1342 (0x53e), region = 76  ;;  %483 = vst.msk [vmem:[#allocation2] sm:$0xff] (!%p425_p9), %vm482_vm0, %v1428_v0  ;;  %616 = vmatprep.subr.bf16.mxu0 (!%p425_p9), %v1429_v1  ;;  %797 = vmatprep.subr.bf16.mxu1 (!%p425_p9), %v1429_v1  ;;  %s1838_s0 = sld [smem:[#allocation10_spill]] (!%p425_p9)  ;;  %vm501_vm2 = vcmask (!%p425_p9), 519424   ;;  %vm511_vm3 = vcmask (!%p425_p9), 781824   ;;  %vm521_vm4 = vcmask (!%p425_p9), 1044224  }
  0x14   : > { %485 = vst.msk [vmem:[#allocation2 + $0x8] sm:$0xf] (!%p425_p9), %vm484_vm1, %v1428_v0  ;;  %s1828_s21 = smov (!%p425_p9), 32   ;;  %s1826_s17 = smov (!%p425_p9), 96   ;;  %v1338_v29 = vld [vmem:[%s1813_s4] sm:$0xff] (!%p425_p9)   ;;  %v1339_v30 = vld [vmem:[%s1813_s4 + $0x8] sm:$0xff] (!%p425_p9)  }
  0x15   : > { %s1830_s28 = smov (!%p425_p9), 64   ;;  %798 = vmatpush1.bf16.msra.mxu1 (!%p425_p9), %v1338_v29  ;;  %v1340_v31 = vld [vmem:[%s1813_s4 + $0x10] sm:$0xff] (!%p425_p9)   ;;  %v1341_v32 = vld [vmem:[%s1813_s4 + $0x18] sm:$0xff] (!%p425_p9)   ;;  %v1342_v33 = vld [vmem:[%s1813_s4 + $0x20] sm:$0xff] (!%p425_p9)   ;;  %s1840_s19 = smov (!%p425_p9), 96   ;;  %vm1433_vm5 = vmmov (!%p425_p9), 0  }
  0x16   : > { %799 = vmatprep.subr.bf16.mxu1 (!%p425_p9), %v1429_v1  ;;  %v1343_v34 = vld [vmem:[%s1813_s4 + $0x28] sm:$0xff] (!%p425_p9)   ;;  %v1215_v35 = vld [vmem:[%s1811_s2] ss:$0 sm:$0xff] (!%p425_p9)  ;;  %v1344_v43 = vld [vmem:[%s1813_s4 + $0x30] sm:$0xff] (!%p425_p9)   ;;  %s1841_s22 = smov (!%p425_p9), 64   ;;  %s1258_s30 = sshll.u32 (!%p425_p9), %s1534_s13, 6 }
  0x17   : > { %v1216_v36 = vld [vmem:[%s1812_s3] ss:$0 sm:$0xff] (!%p425_p9)  ;;  %v1345_v45 = vld [vmem:[%s1813_s4 + $0x38] sm:$0xff] (!%p425_p9)   ;;  %v1347_v49 = vld [vmem:[%s1813_s4 + $0x48] sm:$0xff] (!%p425_p9)  }
  0x18   : > { %v1326_v2 = vld [vmem:[%s1837_s1] sm:$0xff] (!%p425_p9)   ;;  %v1327_v3 = vld [vmem:[%s1837_s1 + $0x8] sm:$0xff] (!%p425_p9)   ;;  %v1328_v5 = vld [vmem:[%s1837_s1 + $0x10] sm:$0xff] (!%p425_p9)  }
  0x19   : > { %617 = vmatpush1.bf16.msra.mxu0 (!%p425_p9), %v1326_v2  ;;  %v1329_v6 = vld [vmem:[%s1837_s1 + $0x18] sm:$0xff] (!%p425_p9)   ;;  %v1330_v12 = vld [vmem:[%s1837_s1 + $0x20] sm:$0xff] (!%p425_p9)   ;;  %v1331_v18 = vld [vmem:[%s1837_s1 + $0x28] sm:$0xff] (!%p425_p9)   ;;  %800 = vmatpush1.bf16.msra.mxu1 (!%p425_p9), %v1339_v30 }
  0x1a   : > { %s1569_s26 = scalar_select %p473_p10, %s1534_s13, 1  ;;  %618 = vmatprep.subr.bf16.mxu0 %v1429_v1  ;;  %v1332_v19 = vld [vmem:[%s1837_s1 + $0x30] sm:$0xff]   ;;  %v1333_v20 = vld [vmem:[%s1837_s1 + $0x38] sm:$0xff]   ;;  %v1334_v21 = vld [vmem:[%s1837_s1 + $0x40] sm:$0xff]   ;;  %801 = vmatprep.subr.bf16.mxu1 %v1429_v1 }
  0x1b   : > { %v1335_v22 = vld [vmem:[%s1837_s1 + $0x48] sm:$0xff]   ;;  %v1346_v46 = vld [vmem:[%s1813_s4 + $0x40] sm:$0xff]   ;;  %s1434_s13 = smov [#allocation5]  }
  0x1c   : > { %s1825_s29 = sshll.u32 %s1569_s26, 3  ;;  %v1350_v2 = vld [vmem:[%s1816_s7] sm:$0xff]  }
  0x1d   : > { %s476_s23 = scalar_lea.vmem %s1838_s0, %s1825_s29  ;;  %619 = vmatpush1.bf16.msra.mxu0 %v1327_v3  ;;  %802 = vmatpush1.bf16.msra.mxu1 %v1340_v31  ;;  %s1839_s29 = smov 32   ;;  %v1351_v3 = vld [vmem:[%s1816_s7 + $0x8] sm:$0xff]  }
  0x1e   : > { %v486_v4 = vld [vmem:[%s476_s23] sm:$0xff]  ;;  %620 = vmatprep.subr.bf16.mxu0 %v1429_v1  ;;  %803 = vmatprep.subr.bf16.mxu1 %v1429_v1  ;;  %s1101_s23 = sld [smem:[#allocation4]] }
  0x1f   : > { %489 = vst.msk [vmem:[#allocation2 + $0x2] sm:$0xff] %vm482_vm0, %v486_v4  ;;  %v1352_v4 = vld [vmem:[%s1816_s7 + $0x10] sm:$0xff]  }
  0x21   : > { %621 = vmatpush1.bf16.msra.mxu0 %v1328_v5  ;;  %804 = vmatpush1.bf16.msra.mxu1 %v1341_v32  ;;  %v1353_v5 = vld [vmem:[%s1816_s7 + $0x18] sm:$0xff]  }
  0x22   : > { %622 = vmatprep.subr.bf16.mxu0 %v1429_v1  ;;  %805 = vmatprep.subr.bf16.mxu1 %v1429_v1 }
  0x25   : > { %623 = vmatpush1.bf16.msra.mxu0 %v1329_v6  ;;  %806 = vmatpush1.bf16.msra.mxu1 %v1342_v33  ;;  %v1354_v6 = vld [vmem:[%s1816_s7 + $0x20] sm:$0xff]  }
  0x26   : > { %v493_v7 = vld [vmem:[#allocation2 + $0x1] sm:$0xff]  ;;  %624 = vmatprep.subr.bf16.mxu0 %v1429_v1  ;;  %807 = vmatprep.subr.bf16.mxu1 %v1429_v1 }
  0x27   : > { %v523_v8 = vld [vmem:[#allocation2 + $0x4] sm:$0xff]  ;;  %v1261_v10 = vpack.c.bf16 %v493_v7, %v493_v7 }
  0x28   : > { %v503_v9 = vld [vmem:[#allocation2 + $0x2] sm:$0xff]  ;;  %v524_v14 = vpack.c.bf16 %v523_v8, %v523_v8  ;;  %v1233_v8 = vld [vmem:[%s1814_s5] ss:$0 sm:$0xff] }
  0x29   : > { %v513_v11 = vld [vmem:[#allocation2 + $0x3] sm:$0xff]  ;;  %498 = vrot.lane.b32.xlu0 %v1261_v10, %s1828_s21  ;;  %v1262_v17 = vpack.c.bf16 %v503_v9, %v503_v9  ;;  %625 = vmatpush1.bf16.msra.mxu0 %v1330_v12  ;;  %v1234_v9 = vld [vmem:[%s1815_s6] ss:$0 sm:$0xff]  ;;  %s470_s21 = sand.u32 1, %s1418_s16  }
  0x2a   : > { %v490_v13 = vld [vmem:[#allocation2] sm:$0xff]  ;;  %v1263_v15 = vpack.c.bf16 %v513_v11, %v513_v11  ;;  %525 = vst.msk [vmem:[#allocation3 + $0x4] sm:$0xf] %vm484_vm1, %v524_v14  ;;  %626 = vmatprep.subr.bf16.mxu0 %v1429_v1  ;;  %808 = vmatpush1.bf16.msra.mxu1 %v1343_v34  ;;  %v1355_v7 = vld [vmem:[%s1816_s7 + $0x28] sm:$0xff]   ;;  %s1108_s27 = scalar_lea.sflag [#allocation6], %s470_s21 }
  0x2b   : > { %v491_v16 = vpack.c.bf16 %v490_v13, %v490_v13  ;;  %809 = vmatprep.subr.bf16.mxu1 %v1429_v1 }
  0x2c   : > { %518 = vrot.lane.b32.xlu1 %v1263_v15, %s1826_s17  ;;  %s1196_s17 = sshll.u32 %s470_s21, 2 }
  0x2d   : > { %492 = vst.msk [vmem:[#allocation3] sm:$0xf] %vm484_vm1, %v491_v16  ;;  %508 = vrot.lane.b32.xlu0 %v1262_v17, %s1830_s28  ;;  %627 = vmatpush1.bf16.msra.mxu0 %v1331_v18  ;;  %v1356_v16 = vld [vmem:[%s1816_s7 + $0x30] sm:$0xff]   ;;  %v1357_v18 = vld [vmem:[%s1816_s7 + $0x38] sm:$0xff]  }
  0x2e   : > { %628 = vmatprep.subr.bf16.mxu0 %v1429_v1  ;;  %810 = vmatpush1.bf16.msra.mxu1 %v1344_v43 }
  0x2f   : > { %811 = vmatprep.subr.bf16.mxu1 %v1429_v1 }
  0x31   : > { %629 = vmatpush1.bf16.msra.mxu0 %v1332_v19  ;;  %v1358_v19 = vld [vmem:[%s1816_s7 + $0x40] sm:$0xff]  }
  0x32   : > { %630 = vmatprep.subr.bf16.mxu0 %v1429_v1  ;;  %812 = vmatpush1.bf16.msra.mxu1 %v1345_v45 }
  0x33   : > { %813 = vmatprep.subr.bf16.mxu1 %v1429_v1 }
  0x35   : > { %631 = vmatpush1.bf16.msra.mxu0 %v1333_v20 }
  0x36   : > { %632 = vmatprep.subr.bf16.mxu0 %v1429_v1  ;;  %814 = vmatpush1.bf16.msra.mxu1 %v1346_v46 }
  0x37   : > { %815 = vmatprep.subr.bf16.mxu1 %v1429_v1 }
  0x39   : > { %633 = vmatpush1.bf16.msra.mxu0 %v1334_v21 }
  0x3a   : > { %634 = vmatprep.subr.bf16.mxu0 %v1429_v1  ;;  %816 = vmatpush1.bf16.msra.mxu1 %v1347_v49  ;;  %v1253_v49 = vld [vmem:[%s1820_s11] ss:$0 sm:$0xff] }
  0x3b   : > { %1273 = vmatprep.subr.bf16.mxu1 %v1428_v0 }
  0x3d   : > { %635 = vmatpush1.bf16.msra.mxu0 %v1335_v22  ;;  %v1359_v22 = vld [vmem:[%s1816_s7 + $0x48] sm:$0xff]  }
  0x3e   : > { %978 = vmatprep.subr.bf16.mxu0 %v1429_v1 }
  0x9b   : > { %v499_v23 = vpop.permute.xlu0 %498 }
  0x9c   : > { %502 = vst.msk [vmem:[#allocation3] sm:$0xf] %vm501_vm2, %v499_v23 }
  0x9e   : > { %v519_v24 = vpop.permute.xlu1 %518 }
  0x9f   : > { %v509_v25 = vpop.permute.xlu0 %508 }
  0xa0   : > { %512 = vst.msk [vmem:[#allocation3] sm:$0xf] %vm511_vm3, %v509_v25 }
  0xa1   : > { %522 = vst.msk [vmem:[#allocation3] sm:$0xf] %vm521_vm4, %v519_v24 }
  0xa8   : > { %v526_v26 = vld [vmem:[#allocation3] sm:$0xff] }
  0xa9   : > { %v1203_v27 = vcombine.high %v526_v26, %v526_v26  ;;  %v1202_v28 = vcombine.low %v526_v26, %v526_v26 }
  0xab   : > { %1214 = vmatprep.mubr.msk.bf16.mxu0 %vm482_vm0, %v1203_v27 }
  0xac   : > { %649 = vmatmul.mubr.bf16.vlgmr.msra.gmra.mrb[0].mxu0 %v1202_v28 }
  0xad   : > { %979 = vmatpush1.bf16.msra.mxu0 %v1350_v2 }
  0xae   : > { %980 = vmatprep.subr.bf16.mxu0 %v1429_v1 }
  0xb1   : > { %981 = vmatpush1.bf16.msra.mxu0 %v1351_v3 }
  0xb2   : > { %982 = vmatprep.subr.bf16.mxu0 %v1429_v1 }
  0xb5   : > { %983 = vmatpush1.bf16.msra.mxu0 %v1352_v4 }
  0xb6   : > { %984 = vmatprep.subr.bf16.mxu0 %v1429_v1 }
  0xb9   : > { %985 = vmatpush1.bf16.msra.mxu0 %v1353_v5 }
  0xba   : > { %986 = vmatprep.subr.bf16.mxu0 %v1429_v1 }
  0xbd   : > { %987 = vmatpush1.bf16.msra.mxu0 %v1354_v6 }
  0xbe   : > { %988 = vmatprep.subr.bf16.mxu0 %v1429_v1 }
  0xc1   : > { %989 = vmatpush1.bf16.msra.mxu0 %v1355_v7 }
  0xc2   : > { %990 = vmatprep.subr.bf16.mxu0 %v1429_v1 }
  0xc5   : > { %991 = vmatpush1.bf16.msra.mxu0 %v1356_v16 }
  0xc6   : > { %992 = vmatprep.subr.bf16.mxu0 %v1429_v1 }
  0xc9   : > { %993 = vmatpush1.bf16.msra.mxu0 %v1357_v18 }
  0xca   : > { %994 = vmatprep.subr.bf16.mxu0 %v1429_v1 }
  0xcd   : > { %995 = vmatpush1.bf16.msra.mxu0 %v1358_v19 }
  0xce   : > { %996 = vmatprep.subr.bf16.mxu0 %v1429_v1 }
  0xd1   : > { %997 = vmatpush1.bf16.msra.mxu0 %v1359_v22 }
 0x17f   : > { %v650_v37 = vpop.f32.mrb[0].mxu0 }
 0x180   : > { %v662_v38 = vmul.f32 %v1215_v35, %v650_v37  ;;  %v652_v39 = vpop.f32.mrb[1].mxu0  ;;  %v1363_v37 = vld [vmem:[%s1819_s10 + $0x8] sm:$0xff]  }
 0x181   : > { %v653_v40 = vpop.f32.mrb[2].mxu0  ;;  %v1252_v39 = vld [vmem:[%s1818_s9] ss:$0 sm:$0xff] }
 0x182   : > { %v669_v41 = vadd.f32 %v1216_v36, %v662_v38  ;;  %v654_v42 = vpop.f32.mrb[3].mxu0  ;;  %v1362_v36 = vld [vmem:[%s1819_s10] sm:$0xff]  }
 0x183   : > { %v1251_v38 = vld [vmem:[%s1817_s8] ss:$0 sm:$0xff] }
 0x184   : > { %v670_v44 = vmax.f32 %v669_v41, 0.0 }
 0x186   : > { %673 = vst.msk [vmem:[#allocation2 + $0x2] sm:$0xff] %vm482_vm0, %v670_v44 }
 0x18d   : > { %v686_v47 = vld [vmem:[#allocation2 + $0x2] sm:$0xff] }
 0x18e   : > { %v677_v48 = vld [vmem:[#allocation2 + $0x1] sm:$0xff]  ;;  %v1265_v50 = vpack.c.bf16 %v686_v47, %v686_v47 }
 0x18f   : > { %v1264_v51 = vpack.c.bf16 %v677_v48, %v677_v48  ;;  %v674_v52 = vld [vmem:[#allocation2] sm:$0xff]  ;;  %v1102_v48 = vstv %s1101_s23  ;;  %s1766_s23 = scalar_lea.hbm %s1823_s14, %s1258_s30 }
 0x190   : > { %v704_v53 = vld [vmem:[#allocation2 + $0x4] sm:$0xff]  ;;  %v675_v55 = vpack.c.bf16 %v674_v52, %v674_v52  ;;  %691 = vrot.lane.b32.xlu0 %v1265_v50, %s1830_s28 }
 0x191   : > { %v695_v54 = vld [vmem:[#allocation2 + $0x3] sm:$0xff]  ;;  %v705_v56 = vpack.c.bf16 %v704_v53, %v704_v53  ;;  %682 = vrot.lane.b32.xlu1 %v1264_v51, %s1839_s29 }
 0x192   : > { %676 = vst.msk [vmem:[#allocation3] sm:$0xf] %vm484_vm1, %v675_v55  ;;  %v1266_v57 = vpack.c.bf16 %v695_v54, %v695_v54 }
 0x193   : > { %706 = vst.msk [vmem:[#allocation3 + $0x4] sm:$0xf] %vm484_vm1, %v705_v56 }
 0x195   : > { %700 = vrot.lane.b32.xlu1 %v1266_v57, %s1840_s19 }
 0x202   : > { %v692_v58 = vpop.permute.xlu0 %691 }
 0x203   : > { %v683_v59 = vpop.permute.xlu1 %682 }
 0x204   : > { %685 = vst.msk [vmem:[#allocation3] sm:$0xf] %vm501_vm2, %v683_v59 }
 0x205   : > { %694 = vst.msk [vmem:[#allocation3] sm:$0xf] %vm511_vm3, %v692_v58 }
 0x207   : > { %v701_v60 = vpop.permute.xlu1 %700 }
 0x208   : > { %703 = vst.msk [vmem:[#allocation3] sm:$0xf] %vm521_vm4, %v701_v60 }
 0x20f   : > { %v707_v61 = vld [vmem:[#allocation3] sm:$0xff] }
 0x210   : > { %v1221_v62 = vcombine.high %v707_v61, %v707_v61  ;;  %v1220_v63 = vcombine.low %v707_v61, %v707_v61 }
 0x212   : > { %1232 = vmatprep.mubr.msk.bf16.mxu1 %vm482_vm0, %v1221_v62 }
 0x213   : > { %830 = vmatmul.mubr.bf16.vlgmr.msra.gmra.mrb[0].mxu1 %v1220_v63 }
 0x214   : > { %1274 = vmatpush3.bf16.msra.mxu1 %v1362_v36  ;;  %1277 = vmatprep.mubr.msk.bf16.mxu1 %vm1433_vm5, %v1428_v0 }
 0x215   : > { %1275 = vmatprep.subr.bf16.mxu1 %v1428_v0 }
 0x218   : > { %1276 = vmatpush3.bf16.msra.mxu1 %v1363_v37 }
 0x2e6   : > { %v831_v10 = vpop.f32.mrb[0].mxu1 }
 0x2e7   : > { %v843_v11 = vmul.f32 %v1233_v8, %v831_v10  ;;  %v833_v12 = vpop.f32.mrb[1].mxu1 }
 0x2e8   : > { %v834_v13 = vpop.f32.mrb[2].mxu1 }
 0x2e9   : > { %v850_v14 = vadd.f32 %v1234_v9, %v843_v11  ;;  %v835_v15 = vpop.f32.mrb[3].mxu1 }
 0x2eb   : > { %v851_v17 = vmax.f32 %v850_v14, 0.0 }
 0x2ed   : > { %854 = vst.msk [vmem:[#allocation2 + $0x2] sm:$0xff] %vm482_vm0, %v851_v17 }
 0x2f4   : > { %v867_v20 = vld [vmem:[#allocation2 + $0x2] sm:$0xff] }
 0x2f5   : > { %v858_v21 = vld [vmem:[#allocation2 + $0x1] sm:$0xff]  ;;  %v1268_v23 = vpack.c.bf16 %v867_v20, %v867_v20 }
 0x2f6   : > { %v1267_v24 = vpack.c.bf16 %v858_v21, %v858_v21  ;;  %v855_v25 = vld [vmem:[#allocation2] sm:$0xff] }
 0x2f7   : > { %v885_v26 = vld [vmem:[#allocation2 + $0x4] sm:$0xff]  ;;  %v856_v28 = vpack.c.bf16 %v855_v25, %v855_v25  ;;  %872 = vrot.lane.b32.xlu1 %v1268_v23, %s1841_s22  ;;  %s1842_s22 = sshll.u32 %s1569_s26, 3  ;;  %s472_s26 = scalar_lea.vmem [#allocation5], %s1196_s17 }
 0x2f8   : > { %v876_v27 = vld [vmem:[#allocation2 + $0x3] sm:$0xff]  ;;  %v886_v29 = vpack.c.bf16 %v885_v26, %v885_v26  ;;  %863 = vrot.lane.b32.xlu0 %v1267_v24, %s1839_s29  ;;  %s1121_s1 = sshll.u32 %s472_s26, 4  ;;  %s1368_s17 = sshll.u32 %s1434_s13, 4  ;;  %s1768_s1 = int_to_ptr.vmem [resolvable:$true] %s1121_s1  ;;  %s1369_s17 = int_to_ptr.vmem [resolvable:$false] %s1368_s17 }
 0x2f9   : > { %857 = vst.msk [vmem:[#allocation3] sm:$0xf] %vm484_vm1, %v856_v28  ;;  %v1269_v1 = vpack.c.bf16 %v876_v27, %v876_v27  ;;  %s1370_s0 = scalar_lea.vmem %s1369_s17, 128  ;;  %p1371_p0 = scmp.lt.s32.totalorder %s1768_s1, %s1369_s17 }
 0x2fa   : > { %887 = vst.msk [vmem:[#allocation3 + $0x4] sm:$0xf] %vm484_vm1, %v886_v29 }
 0x2fc   : > { %881 = vrot.lane.b32.xlu0 %v1269_v1, %s1840_s19  ;;  %s480_s19 = scalar_lea.vmem %s1821_s12, %s1842_s22 }
 0x2fd   : > { %v1100_v0 = vld [vmem:[%s480_s19] sm:$0xff]  ;;  %s1364_s19 = scalar_lea.vmem %s1768_s1, 64 }
 0x2fe   : > { %v1103_v50 = vmul.f32 %v1102_v48, %v1100_v0  ;;  %p1365_p11 = scmp.ne.s32.totalorder %s1768_s1, %s1364_s19  ;;  %p1372_p1 = scmp.lt.s32.totalorder %s1370_s0, %s1364_s19 }
 0x300   : > { %p1366_p12 = pnand %p1365_p11, %p1551_p5  ;;  %p1373_p2 = por %p1372_p1, %p1371_p0 }
 0x302   : > { %p1367_p13 = pneg %p1366_p12 }
 0x304   : > { %p1374_p3 = pnand %p1373_p2, %p1367_p13 }
 0x369   : > { %v873_v30 = vpop.permute.xlu1 %872 }
 0x36a   : > { %v864_v31 = vpop.permute.xlu0 %863 }
 0x36b   : > { %866 = vst.msk [vmem:[#allocation3] sm:$0xf] %vm501_vm2, %v864_v31 }
 0x36c   : > { %875 = vst.msk [vmem:[#allocation3] sm:$0xf] %vm511_vm3, %v873_v30 }
 0x36e   : > { %v882_v32 = vpop.permute.xlu0 %881 }
 0x36f   : > { %884 = vst.msk [vmem:[#allocation3] sm:$0xf] %vm521_vm4, %v882_v32 }
 0x376   : > { %v888_v33 = vld [vmem:[#allocation3] sm:$0xff] }
 0x377   : > { %v1239_v34 = vcombine.high %v888_v33, %v888_v33  ;;  %v1238_v35 = vcombine.low %v888_v33, %v888_v33 }
 0x379   : > { %1250 = vmatprep.mubr.msk.bf16.mxu0 %vm482_vm0, %v1239_v34 }
 0x37a   : > { %1011 = vmatmul.mubr.bf16.vlgmr.msra.gmra.mrb[4].mxu0 %v1238_v35 }
 0x44d   : > { %v1012_v40 = vpop.f32.mrb[4].mxu0 }
 0x44e   : > { %v1024_v41 = vmul.f32 %v1251_v38, %v1012_v40  ;;  %v1014_v42 = vpop.f32.mrb[5].mxu0 }
 0x44f   : > { %v1015_v43 = vpop.f32.mrb[6].mxu0 }
 0x450   : > { %v1031_v44 = vadd.f32 %v1252_v39, %v1024_v41  ;;  %v1016_v45 = vpop.f32.mrb[7].mxu0 }
 0x452   : > { %v1032_v46 = vmax.f32 %v1031_v44, 0.0 }
 0x454   : > { %v1033_v47 = vpack.c.bf16 %v1032_v46, %v1032_v46 }
 0x456   : > { %1278 = vmatmul.mubr.msk.bf16.vlgmr.msra.gmra.mrb[4].mxu1 %vm482_vm0, %v1033_v47 }
 0x529   : > { %v1094_v51 = vpop.f32.mrb[4].mxu1 }
 0x52a   : > { %v1095_v52 = vadd.f32 %v1253_v49, %v1094_v51  ;;  %v1279_v53 = vpop.f32.mrb[5].mxu1 }
 0x52b   : > { %v1097_v54 = vpop.f32.mrb[6].mxu1 }
 0x52c   : > { %v1104_v55 = vadd.f32 %v1103_v50, %v1095_v52  ;;  %v1280_v56 = vpop.f32.mrb[7].mxu1 }
 0x52e   : > { %v1105_v57 = vpack.c.bf16 %v1104_v55, %v1104_v55 }
 0x530   : > { %1106 = vst.msk [vmem:[%s472_s26] sm:$0xf] %vm484_vm1, %v1105_v57 }
 0x531   : > { %1377 = shalt.err (!%p1374_p3)
}
 0x532   : > { %s1378_s21 = scalar_lea.hbm %s1766_s23, 64  ;;  %s1382_s26 = scalar_lea.hbm %s1823_s14, 128 }
 0x533   : > { %p1379_p4 = scmp.ne.s32.totalorder %s1766_s23, %s1378_s21  ;;  %p1383_p9 = scmp.lt.u32.totalorder %s1766_s23, %s1823_s14 }
 0x534   : > { %p1384_p10 = scmp.lt.u32.totalorder %s1382_s26, %s1378_s21  ;;  %p1386_p12 = scmp.lt.u32.totalorder %s1378_s21, %s1766_s23 }
 0x535   : > { %p1380_p7 = pnand %p1379_p4, %p1551_p5 }
 0x536   : > { %p1385_p11 = por %p1384_p10, %p1383_p9 }
 0x537   : > { %p1381_p8 = pneg %p1380_p7 }
 0x538   : > { %p1387_p13 = por %p1386_p12, %p1385_p11 }
 0x53a   : > { %p1388_p0 = pnand %p1387_p13, %p1381_p8 }
 0x53c   : > { %1391 = shalt.err (!%p1388_p0)
}
 0x53d   : > { %1281 = dma.vmem_to_hbm [thread:$0]  (%p1551_p5), %s1768_s1, 64, %s1766_s23, %s1108_s27  }
 0x53e PF: > { %p1287_p1 = scmp.ge.s32.totalorder %s1426_s18, 2  ;;  %s1133_s19 = sand.u32 1, %s1414_s15  }
 0x53f   : > { %s1134_s13 = scalar_lea.sflag [#allocation6], %s1133_s19 }
 0x540   : > { %p1284_p2 = pnand %p1287_p1, %p1555_p6 }
 0x542   : > { %1409 = dma.done.wait (!%p1284_p2), %s1134_s13, 64  }
 0x543   : > { %1411 = vsyncadd (!%p1284_p2), %s1134_s13, 4294967232  ;;  %s1843_s17 = sld [smem:[#allocation8_spill]]  ;;  %s1844_s0 = sld [smem:[#allocation9_spill]] }
 0x544   : > { %p25_p3 = scmp.ge.s32.totalorder %s1538_s20, 4   ;;  %s1845_s15 = smov %s1418_s16 }
 0x545   : > { %s1848_s18 = smov %s1538_s20 }
 0x546   :  { %27 = sbr.rel (!%p25_p3) target bundleno = 7 (0x7), region = 114 }
 0x549   : > { %s1846_s16 = smov %s1843_s17  ;;  %s1847_s17 = smov %s1844_s0 }
 0x54d   :  { %1139 = vsyncpa [#allocation6], 1 }
 0x54e   :  { %1141 = vsyncpa [#allocation6 + $0x1], 1 }

</bundles_post_ra>
